<compile_context>
chip_gen: v6e
topology: v6e:2x2x1
jax: 0.10.0
libtpu: 0.0.40
codegen_flags: <defaults>
</compile_context>

<pallas_src>
import functools

import jax
import jax.numpy as jnp
from jax.experimental import pallas as pl
from jax.experimental.pallas import tpu as pltpu


# ----------------------------------------------------------------------------
# Kernel
# ----------------------------------------------------------------------------
def seqnet_kernel(x_ref, w_ref, b_ref, o_ref, *, w):
    # x_ref: [TB, S, C] raw sequence tile
    # w_ref: [K_pad, TO] conv weight (tap-major, zero-padded rows)
    # b_ref: [1, TO]     bias (f32)
    # o_ref: [TB, TO]    output tile (f32)
    tb, s, c = x_ref.shape
    k_pad = w_ref.shape[0]
    l_out = s - w + 1
    inv_l = 1.0 / l_out

    # Sliding-window temporal sums, one per conv tap (XLU/VPU; hidden under MXU).
    parts = [
        jnp.sum(x_ref[:, k:k + l_out, :].astype(jnp.float32), axis=1)  # [TB, C]
        for k in range(w)
    ]
    pad = k_pad - w * c
    if pad:
        parts.append(jnp.zeros((tb, pad), jnp.float32))
    xwin = jnp.concatenate(parts, axis=-1) if len(parts) > 1 else parts[0]
    xwin = (xwin * inv_l).astype(w_ref.dtype)              # [TB, K_pad]

    acc = jnp.dot(xwin, w_ref[...], preferred_element_type=jnp.float32)
    o_ref[...] = (acc + b_ref[...].astype(jnp.float32)).astype(o_ref.dtype)


# ----------------------------------------------------------------------------
# Helpers
# ----------------------------------------------------------------------------
def _round_up(n, m):
    return ((n + m - 1) // m) * m


def _vmem_budget_bytes():
    """Per-generation VMEM budget: ~3/4 of physical, capped at 100 MiB.
    v7x (64 MiB) -> 48 MiB; v5e/v6e (128 MiB) -> 96 MiB."""
    phys = 64 << 20  # conservative fallback: v7x per-TC VMEM
    try:
        info = pltpu.get_tpu_info()
        phys = int(getattr(info, "vmem_capacity_bytes", phys)) or phys
    except Exception:
        pass
    return int(min(phys * 3 // 4, 100 << 20))


def _choose_batch_tile(batch, per_row_bytes, fixed_bytes, budget, sublane):
    """Largest batch tile fitting the VMEM budget left after the (double-
    buffered) weight/bias blocks, rounded to the dtype sublane multiple."""
    b_pad = _round_up(batch, sublane)
    avail = budget - fixed_bytes - (2 << 20)               # headroom
    tb = avail // max(per_row_bytes, 1)
    tb = max(sublane, (tb // sublane) * sublane)
    tb = min(tb, 512)            # 512-row tiles already ~85% of HBM roofline
    if b_pad >= 256 and b_pad <= tb:
        # force >=2 batch steps: DMA/compute/writeback overlap + megacore split
        tb = _round_up(pl.cdiv(b_pad, 2), sublane)
    return max(sublane, min(tb, b_pad))


# ----------------------------------------------------------------------------
# Parameter preparation (hoist out of the per-call path; depends only on params)
# ----------------------------------------------------------------------------
def prepare_seqnet_params(weight_ock, bias, *, compute_dtype=jnp.bfloat16,
                          vmem_budget=None):
    """weight_ock: [outDims, inDims, w] (torch Conv1d layout), bias: [outDims].
    Returns padded/cast weight [K_pad, O_pad], f32 bias [1, O_pad] and static
    tiling metadata. Call once per parameter set and reuse across forwards."""
    O, C, W = weight_ock.shape
    K = W * C
    K_pad = _round_up(K, 128)
    cdt = jnp.dtype(compute_dtype)
    if vmem_budget is None:
        vmem_budget = _vmem_budget_bytes()

    # Output-channel tile: keep the double-buffered weight block within ~1/3 of
    # the budget, lane-dense multiple of 128.
    to = (vmem_budget // 3) // (2 * K_pad * cdt.itemsize)
    to = max(128, (to // 128) * 128)
    to = min(to, 2048, _round_up(O, 128))
    O_pad = _round_up(O, to)

    # [O, C, W] -> [W, C, O] -> [K, O], zero-pad to [K_pad, O_pad], cast.
    w_ko = jnp.transpose(weight_ock, (2, 1, 0)).reshape(K, O)
    w_ko = jnp.pad(w_ko, ((0, K_pad - K), (0, O_pad - O))).astype(cdt)
    b_row = jnp.pad(bias.astype(jnp.float32), (0, O_pad - O)).reshape(1, O_pad)

    return dict(weight=w_ko, bias=b_row, w=W, in_dims=C, out_dims=O,
                k_pad=K_pad, o_pad=O_pad, o_tile=to, compute_dtype=cdt,
                vmem_budget=int(vmem_budget))


# ----------------------------------------------------------------------------
# Forward
# ----------------------------------------------------------------------------
def seqnet_apply(x, params):
    """x: [B, seqL, inDims] (or [B, inDims]; unsqueezed like the module).
    Returns [B, outDims] float32."""
    if x.ndim < 3:
        x = x[:, None, :]                                  # torch x.unsqueeze(1)
    B, S, C = x.shape
    W = params["w"]
    assert C == params["in_dims"], "inDims mismatch"
    assert S >= W, "sequence shorter than conv kernel"

    cdt = params["compute_dtype"]
    isz = cdt.itemsize
    K_pad, O_pad, TO = params["k_pad"], params["o_pad"], params["o_tile"]
    budget = params["vmem_budget"]

    sub = 8 if isz >= 4 else 16                            # sublane multiple
    # Per-batch-row VMEM bytes: 2x-buffered x DMA, 2x-buffered f32 out, f32 temps.
    per_row = 2 * S * C * isz + 2 * TO * 4 + S * C * 4 + K_pad * 4 + TO * 4
    # Fixed bytes: double-buffered weight + bias blocks.
    fixed = 2 * K_pad * TO * isz + 2 * TO * 4

    TB = _choose_batch_tile(B, per_row, fixed, budget, sub)
    B_pad = _round_up(B, TB)

    xw = x.astype(cdt)
    if B_pad != B:
        xw = jnp.pad(xw, ((0, B_pad - B), (0, 0), (0, 0)))

    num_b = B_pad // TB
    num_o = O_pad // TO

    vmem_bytes = int(min(max(fixed + TB * per_row + (2 << 20), 4 << 20), budget))

    cost = pl.CostEstimate(
        flops=2 * B_pad * K_pad * O_pad,
        transcendentals=0,
        bytes_accessed=(num_o * B_pad * S * C * isz      # x re-read per o-tile
                        + K_pad * O_pad * isz            # weight read once
                        + O_pad * 4
                        + B_pad * O_pad * 4),
    )

    kern = functools.partial(seqnet_kernel, w=W)
    out_padded = pl.pallas_call(
        kern,
        out_shape=jax.ShapeDtypeStruct((B_pad, O_pad), jnp.float32),
        grid=(num_o, num_b),   # batch innermost: weight block loaded once per o-tile
        in_specs=[
            pl.BlockSpec((TB, S, C), lambda o, b: (b, 0, 0)),   # raw x, batch-tiled
            pl.BlockSpec((K_pad, TO), lambda o, b: (0, o)),     # weight, streamed by o
            pl.BlockSpec((1, TO), lambda o, b: (0, o)),         # bias, per o-tile
        ],
        out_specs=pl.BlockSpec((TB, TO), lambda o, b: (b, o)),
        compiler_params=pltpu.CompilerParams(
            dimension_semantics=("parallel", "parallel"),
            vmem_limit_bytes=vmem_bytes,
        ),
        cost_estimate=cost,
    )(xw, params["weight"], params["bias"])

    return out_padded[:B, :params["out_dims"]]


def seqnet_forward(x, weight_ock, bias, *, compute_dtype=jnp.bfloat16):
    """Convenience wrapper. For repeated calls, hoist prepare_seqnet_params."""
    params = prepare_seqnet_params(weight_ock, bias, compute_dtype=compute_dtype)
    return seqnet_apply(x, params)


# ----------------------------------------------------------------------------
# Pure-JAX reference (matches torch Conv1d(NCL) + mean(-1))
# ----------------------------------------------------------------------------
def seqnet_reference(x, weight_ock, bias):
    B, S, C = x.shape
    O, _, W = weight_ock.shape
    L_out = S - W + 1
    cols = [jnp.einsum('bkc,ock->bo', x[:, t:t + W, :], weight_ock)
            for t in range(L_out)]
    conv = jnp.stack(cols, axis=-1) + bias[None, :, None]   # [B, O, L_out]
    return jnp.mean(conv, axis=-1)


if __name__ == "__main__":
    # seqNet(inDims=16, outDims=32, seqL=8, w=5), batch=2
    B, S, C, O, W = 2, 8, 16, 32, 5

    key = jax.random.PRNGKey(0)
    kx, kw, kb = jax.random.split(key, 3)

    x = jax.random.normal(kx, (B, S, C), dtype=jnp.float32)

    # nn.Conv1d-style uniform(-bound, bound) init; torch layout [O, C, W].
    bound = 1.0 / jnp.sqrt(jnp.float32(C * W))
    weight_ock = jax.random.uniform(kw, (O, C, W), dtype=jnp.float32,
                                    minval=-bound, maxval=bound)
    bias = jax.random.uniform(kb, (O,), dtype=jnp.float32,
                              minval=-bound, maxval=bound)

    ref = seqnet_reference(x, weight_ock, bias)

    # Default bf16-operand path (f32 MXU accumulation); params prepared once.
    params_bf16 = prepare_seqnet_params(weight_ock, bias,
                                        compute_dtype=jnp.bfloat16)
    out_bf16 = jax.block_until_ready(seqnet_apply(x, params_bf16))
    assert out_bf16.shape == (B, O)
    assert jnp.allclose(out_bf16, ref, atol=2e-2, rtol=2e-2), "bf16 mismatch vs reference"

    # f32-operand path (tight tolerance).
    params_f32 = prepare_seqnet_params(weight_ock, bias,
                                       compute_dtype=jnp.float32)
    out_f32 = jax.block_until_ready(seqnet_apply(x, params_f32))
    assert out_f32.shape == (B, O)
    assert jnp.allclose(out_f32, ref, atol=1e-5, rtol=1e-5), "f32 mismatch vs reference"

    print("KERNEL_OK")
</pallas_src>

<mosaic_0001>
module attributes {stable_mosaic.version = 11 : i64} {
  func.func @seqnet_kernel(%arg0: i32, %arg1: i32, %arg2: memref<16x8x16xbf16, #tpu.memory_space<vmem>>, %arg3: memref<128x128xbf16, #tpu.memory_space<vmem>>, %arg4: memref<1x128xf32, #tpu.memory_space<vmem>>, %arg5: memref<16x128xf32, #tpu.memory_space<vmem>>) attributes {dimension_semantics = [#tpu.dimension_semantics<parallel>, #tpu.dimension_semantics<parallel>], iteration_bounds = array<i64: 1, 1>, scalar_prefetch = 0 : i64, scratch_operands = 0 : i64, tpu.core_type = #tpu.core_type<tc>, window_params = [{transform_indices = @transform_0, window_bounds = array<i64: 16, 8, 16>}, {transform_indices = @transform_1, window_bounds = array<i64: 128, 128>}, {transform_indices = @transform_2, window_bounds = array<i64: 1, 128>}, {transform_indices = @transform_3, window_bounds = array<i64: 16, 128>}]} {
    %c0 = arith.constant 0 : index
    %c0_0 = arith.constant 0 : index
    %c0_1 = arith.constant 0 : index
    %0 = vector.load %arg2[%c0, %c0_0, %c0_1] : memref<16x8x16xbf16, #tpu.memory_space<vmem>>, vector<16x4x16xbf16>
    %1 = arith.extf %0 : vector<16x4x16xbf16> to vector<16x4x16xf32>
    %cst = arith.constant dense<0.000000e+00> : vector<16x16xf32>
    %2 = vector.multi_reduction <add>, %1, %cst [1] : vector<16x4x16xf32> to vector<16x16xf32>
    %c0_2 = arith.constant 0 : index
    %c1 = arith.constant 1 : index
    %c0_3 = arith.constant 0 : index
    %3 = vector.load %arg2[%c0_2, %c1, %c0_3] : memref<16x8x16xbf16, #tpu.memory_space<vmem>>, vector<16x4x16xbf16>
    %4 = arith.extf %3 : vector<16x4x16xbf16> to vector<16x4x16xf32>
    %cst_4 = arith.constant dense<0.000000e+00> : vector<16x16xf32>
    %5 = vector.multi_reduction <add>, %4, %cst_4 [1] : vector<16x4x16xf32> to vector<16x16xf32>
    %c0_5 = arith.constant 0 : index
    %c2 = arith.constant 2 : index
    %c0_6 = arith.constant 0 : index
    %6 = vector.load %arg2[%c0_5, %c2, %c0_6] : memref<16x8x16xbf16, #tpu.memory_space<vmem>>, vector<16x4x16xbf16>
    %7 = arith.extf %6 : vector<16x4x16xbf16> to vector<16x4x16xf32>
    %cst_7 = arith.constant dense<0.000000e+00> : vector<16x16xf32>
    %8 = vector.multi_reduction <add>, %7, %cst_7 [1] : vector<16x4x16xf32> to vector<16x16xf32>
    %c0_8 = arith.constant 0 : index
    %c3 = arith.constant 3 : index
    %c0_9 = arith.constant 0 : index
    %9 = vector.load %arg2[%c0_8, %c3, %c0_9] : memref<16x8x16xbf16, #tpu.memory_space<vmem>>, vector<16x4x16xbf16>
    %10 = arith.extf %9 : vector<16x4x16xbf16> to vector<16x4x16xf32>
    %cst_10 = arith.constant dense<0.000000e+00> : vector<16x16xf32>
    %11 = vector.multi_reduction <add>, %10, %cst_10 [1] : vector<16x4x16xf32> to vector<16x16xf32>
    %c0_11 = arith.constant 0 : index
    %c4 = arith.constant 4 : index
    %c0_12 = arith.constant 0 : index
    %12 = vector.load %arg2[%c0_11, %c4, %c0_12] : memref<16x8x16xbf16, #tpu.memory_space<vmem>>, vector<16x4x16xbf16>
    %13 = arith.extf %12 : vector<16x4x16xbf16> to vector<16x4x16xf32>
    %cst_13 = arith.constant dense<0.000000e+00> : vector<16x16xf32>
    %14 = vector.multi_reduction <add>, %13, %cst_13 [1] : vector<16x4x16xf32> to vector<16x16xf32>
    %cst_14 = arith.constant 0.000000e+00 : f32
    %15 = vector.broadcast %cst_14 : f32 to vector<16x48xf32>
    %16 = tpu.concatenate %2, %5, %8, %11, %14, %15 in 1 : vector<16x16xf32>, vector<16x16xf32>, vector<16x16xf32>, vector<16x16xf32>, vector<16x16xf32>, vector<16x48xf32> -> vector<16x128xf32>
    %cst_15 = arith.constant 2.500000e-01 : f32
    %17 = vector.broadcast %cst_15 : f32 to vector<16x128xf32>
    %18 = arith.mulf %16, %17 : vector<16x128xf32>
    %19 = arith.truncf %18 : vector<16x128xf32> to vector<16x128xbf16>
    %c0_16 = arith.constant 0 : index
    %c0_17 = arith.constant 0 : index
    %20 = vector.load %arg3[%c0_16, %c0_17] : memref<128x128xbf16, #tpu.memory_space<vmem>>, vector<128x128xbf16>
    %cst_18 = arith.constant dense<0.000000e+00> : vector<16x128xf32>
    %21 = tpu.matmul %19, %20, %cst_18 {dimension_numbers = #tpu.dot_dimension_numbers<[1], [0], [0], [1], [0, 0, 1, 1], [], []>} : vector<16x128xbf16>, vector<128x128xbf16>, vector<16x128xf32> -> vector<16x128xf32>
    %c0_19 = arith.constant 0 : index
    %c0_20 = arith.constant 0 : index
    %22 = vector.load %arg4[%c0_19, %c0_20] : memref<1x128xf32, #tpu.memory_space<vmem>>, vector<1x128xf32>
    %23 = vector.broadcast %22 : vector<1x128xf32> to vector<16x128xf32>
    %24 = arith.addf %21, %23 : vector<16x128xf32>
    %c0_21 = arith.constant 0 : index
    %c0_22 = arith.constant 0 : index
    %25 = vector.load %arg5[%c0_21, %c0_22] : memref<16x128xf32, #tpu.memory_space<vmem>>, vector<16x128xf32>
    tpu.vector_store %arg5[%c0_21, %c0_22], %24 {strides = array<i32>} : memref<16x128xf32, #tpu.memory_space<vmem>>, vector<16x128xf32>,
    return
  }
  func.func @transform_0(%arg0: i32, %arg1: i32) -> (i32, i32, i32) {
    %c0_i32 = arith.constant 0 : i32
    %c0_i32_0 = arith.constant 0 : i32
    %c0_i32_1 = arith.constant 0 : i32
    return %arg1, %c0_i32, %c0_i32_0 : i32, i32, i32
  }
  func.func @transform_1(%arg0: i32, %arg1: i32) -> (i32, i32) {
    %c0_i32 = arith.constant 0 : i32
    %c0_i32_0 = arith.constant 0 : i32
    return %c0_i32, %arg0 : i32, i32
  }
  func.func @transform_2(%arg0: i32, %arg1: i32) -> (i32, i32) {
    %c0_i32 = arith.constant 0 : i32
    %c0_i32_0 = arith.constant 0 : i32
    return %c0_i32, %arg0 : i32, i32
  }
  func.func @transform_3(%arg0: i32, %arg1: i32) -> (i32, i32) {
    %c0_i32 = arith.constant 0 : i32
    return %arg1, %arg0 : i32, i32
  }
}

</mosaic_0001>

<bundles_post_ra>
// kernel: tpu_custom_call.1
= control target key start
LH: loop header
LB: loop body
LE: loop exit
PB: predicated region body
PF: predicated region fallthrough
CT: control target
= control target key end

     0   :  { %8 = vsyncpa [#allocation3], 0  ;;  %s1620_s0 = inlined_call_operand.hbm [shape: bf16[16,8,16], index: 0, kind: input, shape index: {}]   ;;  %s1621_s1 = inlined_call_operand.hbm [shape: bf16[128,128], index: 1, kind: input, shape index: {}]   ;;  %s1622_s2 = inlined_call_operand.vmem [shape: f32[1,128], index: 2, kind: input, shape index: {}]   ;;  %s1623_s3 = inlined_call_operand.hbm [shape: f32[16,128], index: 3, kind: output, shape index: {}]  }
   0x1   :  { %9 = vsyncpa [#allocation6], 0 }
   0x2   :  { %10 = vsyncpa [#allocation4], 0  ;;  %s1414_s12 = smov [#allocation2]  }
   0x3   :  { %s16_s13 = sshll.u32 %s1414_s12, 4  ;;  %s17_s13 = int_to_ptr.vmem [resolvable:$true] %s16_s13 }
   0x4   :  { %s1356_s14 = scalar_lea.vmem %s17_s13, 1024  ;;  %p1361_p1 = scmp.lt.s32.totalorder %s17_s13, %s17_s13 }
   0x5   :  { %p1357_p0 = scmp.ne.s32.totalorder %s17_s13, %s1356_s14  ;;  %p1362_p2 = scmp.lt.s32.totalorder %s1356_s14, %s1356_s14 }
   0x7   :  { %p1363_p3 = por %p1362_p2, %p1361_p1 }
   0x9   :  { %p1364_p4 = pnand %p1363_p3, %p1357_p0 }
   0xb   :  { %1367 = shalt.err (!%p1364_p4)
}
   0xc   :  { %s1415_s15 = smov 64   ;;  %s1416_s16 = smov 4  }
   0xd   :  { %22 = dma.hbm_to_vmem [thread:$0]  %s1620_s0, 1024, %s17_s13, [#allocation3], %s1415_s15, %s1415_s15, %s1416_s16  }
   0xe   :  { %s1417_s19 = smov [#allocation5]  }
   0xf   :  { %s28_s20 = sshll.u32 %s1417_s19, 4  ;;  %s29_s20 = int_to_ptr.vmem [resolvable:$true] %s28_s20 }
  0x10   :  { %s1376_s21 = scalar_lea.vmem %s29_s20, 1024  ;;  %p1381_p6 = scmp.lt.s32.totalorder %s29_s20, %s29_s20 }
  0x11   :  { %p1377_p5 = scmp.ne.s32.totalorder %s29_s20, %s1376_s21  ;;  %p1382_p7 = scmp.lt.s32.totalorder %s1376_s21, %s1376_s21 }
  0x13   :  { %p1383_p8 = por %p1382_p7, %p1381_p6 }
  0x15   :  { %p1384_p9 = pnand %p1383_p8, %p1377_p5 }
  0x17   :  { %1387 = shalt.err (!%p1384_p9)
}
  0x18   :  { %34 = dma.hbm_to_vmem [thread:$0]  %s1621_s1, 1024, %s29_s20, [#allocation6], %s1415_s15, %s1415_s15, %s1416_s16  }
  0x19   :  { %1408 = dma.done.wait [#allocation3], 1024  }
  0x1a   :  { %1409 = vsyncadd [#allocation3], 4294966272 }
  0x1b   :  { %1410 = dma.done.wait [#allocation6], 1024  }
  0x1c   :  { %1411 = vsyncadd [#allocation6], 4294966272  ;;  %v381_v0 = vld [vmem:[#allocation2] sm:$0x6]  ;;  %v382_v1 = vld [vmem:[#allocation2 + $0x4] sm:$0x6] }
  0x1d   :  { %v383_v2 = vld [vmem:[#allocation2 + $0x8] sm:$0x6]  ;;  %v384_v3 = vld [vmem:[#allocation2 + $0xc] sm:$0x6]  ;;  %v385_v4 = vld [vmem:[#allocation2 + $0x10] sm:$0x6]  ;;  %v397_v6 = vunpack.c.l.bf16 %v381_v0  ;;  %v398_v7 = vunpack.c.l.bf16 %v382_v1 }
  0x1e   :  { %v386_v5 = vld [vmem:[#allocation2 + $0x14] sm:$0x6]  ;;  %v399_v8 = vunpack.c.l.bf16 %v383_v2  ;;  %vm76_vm0 = vcmask 125952   ;;  %v387_v9 = vld [vmem:[#allocation2 + $0x18] sm:$0x6]  ;;  %v400_v11 = vunpack.c.l.bf16 %v384_v3  ;;  %v401_v12 = vunpack.c.l.bf16 %v385_v4  ;;  %s1418_s0 = smov 32  }
  0x1f   :  { %v388_v10 = vld [vmem:[#allocation2 + $0x1c] sm:$0x6]  ;;  %v402_v13 = vunpack.c.l.bf16 %v386_v5  ;;  %v403_v14 = vunpack.c.l.bf16 %v387_v9  ;;  %v429_v16 = vrot.slane %v397_v6, 2  ;;  %v430_v17 = vrot.slane %v398_v7, 2  ;;  %v189_v2 = vld [vmem:[#allocation2] sm:$0x7] }
  0x20   :  { %v404_v15 = vunpack.c.l.bf16 %v388_v10  ;;  %v431_v18 = vrot.slane %v399_v8, 2  ;;  %v432_v19 = vrot.slane %v400_v11, 2  ;;  %v433_v20 = vrot.slane %v401_v12, 2  ;;  %v190_v7 = vld [vmem:[#allocation2 + $0x4] sm:$0x7]  ;;  %s1419_s1 = smov 16  }
  0x21   :  { %v434_v21 = vrot.slane %v402_v13, 2  ;;  %v435_v22 = vrot.slane %v403_v14, 2  ;;  %v461_v24 = vsel %vm76_vm0, %v429_v16, 0.0  ;;  %v468_v25 = vsel %vm76_vm0, %v430_v17, 0.0  ;;  %v191_v12 = vld [vmem:[#allocation2 + $0x8] sm:$0x7] }
  0x22   :  { %v436_v23 = vrot.slane %v404_v15, 2  ;;  %v462_v26 = vrot.slane %v461_v24, 4  ;;  %v469_v27 = vrot.slane %v468_v25, 4  ;;  %v475_v28 = vsel %vm76_vm0, %v431_v18, 0.0  ;;  %v192_v13 = vld [vmem:[#allocation2 + $0xc] sm:$0x7] }
  0x23   :  { %v482_v29 = vsel %vm76_vm0, %v432_v19, 0.0  ;;  %v476_v30 = vrot.slane %v475_v28, 4  ;;  %v489_v32 = vsel %vm76_vm0, %v433_v20, 0.0  ;;  %v496_v33 = vsel %vm76_vm0, %v434_v21, 0.0  ;;  %v193_v14 = vld [vmem:[#allocation2 + $0x10] sm:$0x7] }
  0x24   :  { %v483_v31 = vrot.slane %v482_v29, 4  ;;  %vm973_vm1 = vcmask 1041409   ;;  %v463_v34 = vadd.f32 %v462_v26, %v461_v24  ;;  %v470_v35 = vadd.f32 %v469_v27, %v468_v25  ;;  %v194_v18 = vld [vmem:[#allocation2 + $0x14] sm:$0x7]  ;;  %v196_v24 = vld [vmem:[#allocation2 + $0x1c] sm:$0x7] }
  0x25   :  { %v490_v36 = vrot.slane %v489_v32, 4  ;;  %v497_v37 = vrot.slane %v496_v33, 4  ;;  %vm975_vm2 = vcmask 1042434   ;;  %v477_v38 = vadd.f32 %v476_v30, %v475_v28  ;;  %s1420_s24 = smov 48   ;;  %s1423_s27 = smov [#allocation7]  }
  0x26   :  { %v484_v39 = vadd.f32 %v483_v31, %v482_v29  ;;  %v503_v40 = vsel %vm76_vm0, %v435_v22, 0.0  ;;  %v510_v41 = vsel %vm76_vm0, %v436_v23, 0.0  ;;  %vm977_vm3 = vcmask 1043459   ;;  %v195_v23 = vld [vmem:[#allocation2 + $0x18] sm:$0x7]  ;;  %s1277_s28 = sshll.u32 %s1423_s27, 4  ;;  %s1278_s28 = int_to_ptr.vmem [resolvable:$true] %s1277_s28 }
  0x27   :  { %v464_v42 = vrot.slane %v463_v34, 2  ;;  %v471_v43 = vrot.slane %v470_v35, 2  ;;  %v491_v44 = vadd.f32 %v490_v36, %v489_v32  ;;  %v498_v45 = vadd.f32 %v497_v37, %v496_v33  ;;  %s1388_s29 = scalar_lea.vmem %s1278_s28, 256  ;;  %p1393_p11 = scmp.lt.s32.totalorder %s1278_s28, %s1278_s28 }
  0x28   :  { %vm979_vm4 = vcmask 1044484   ;;  %v478_v46 = vrot.slane %v477_v38, 2  ;;  %v485_v47 = vrot.slane %v484_v39, 2  ;;  %v504_v48 = vrot.slane %v503_v40, 4  ;;  %p1389_p10 = scmp.ne.s32.totalorder %s1278_s28, %s1388_s29  ;;  %p1394_p12 = scmp.lt.s32.totalorder %s1388_s29, %s1388_s29 }
  0x29   :  { %v511_v49 = vrot.slane %v510_v41, 4  ;;  %vm981_vm5 = vcmask 1045509   ;;  %v465_v50 = vadd.f32 %v464_v42, %v463_v34  ;;  %v472_v51 = vadd.f32 %v471_v43, %v470_v35 }
  0x2a   :  { %v492_v52 = vrot.slane %v491_v44, 2  ;;  %v499_v53 = vrot.slane %v498_v45, 2  ;;  %vm983_vm6 = vcmask 1046534   ;;  %v479_v54 = vadd.f32 %v478_v46, %v477_v38  ;;  %p1395_p13 = por %p1394_p12, %p1393_p11 }
  0x2b   :  { %v486_v55 = vadd.f32 %v485_v47, %v484_v39  ;;  %v505_v56 = vadd.f32 %v504_v48, %v503_v40  ;;  %v512_v57 = vadd.f32 %v511_v49, %v510_v41  ;;  %vm985_vm7 = vcmask 1047559  }
  0x2c   :  { %v466_v58 = vrot.slane %v465_v50, 1  ;;  %v473_v59 = vrot.slane %v472_v51, 1  ;;  %v493_v60 = vadd.f32 %v492_v52, %v491_v44  ;;  %v500_v61 = vadd.f32 %v499_v53, %v498_v45  ;;  %p1396_p0 = pnand %p1395_p13, %p1389_p10 }
  0x2d   :  { %v480_v62 = vrot.slane %v479_v54, 1  ;;  %v487_v63 = vrot.slane %v486_v55, 1  ;;  %v506_v0 = vrot.slane %v505_v56, 2  ;;  %v513_v1 = vrot.slane %v512_v57, 2 }
  0x2e   :  { %v467_v3 = vadd.f32 %v466_v58, %v465_v50  ;;  %v474_v4 = vadd.f32 %v473_v59, %v472_v51  ;;  %v494_v5 = vrot.slane %v493_v60, 1  ;;  %v501_v6 = vrot.slane %v500_v61, 1 }
  0x2f   :  { %v481_v8 = vadd.f32 %v480_v62, %v479_v54  ;;  %v488_v9 = vadd.f32 %v487_v63, %v486_v55  ;;  %v507_v10 = vadd.f32 %v506_v0, %v505_v56  ;;  %v514_v11 = vadd.f32 %v513_v1, %v512_v57 }
  0x30   :  { %v495_v15 = vadd.f32 %v494_v5, %v493_v60  ;;  %v502_v16 = vadd.f32 %v501_v6, %v500_v61  ;;  %v1048_v17 = vsel %vm973_vm1, %v474_v4, %v467_v3  ;;  %v205_v19 = vunpack.c.l.bf16 %v189_v2 }
  0x31   :  { %v508_v20 = vrot.slane %v507_v10, 1  ;;  %v515_v21 = vrot.slane %v514_v11, 1  ;;  %v1049_v22 = vsel %vm975_vm2, %v481_v8, %v1048_v17  ;;  %v206_v25 = vunpack.c.l.bf16 %v190_v7 }
  0x32   :  { %v1050_v26 = vsel %vm977_vm3, %v488_v9, %v1049_v22  ;;  %v207_v27 = vunpack.c.l.bf16 %v191_v12  ;;  %v208_v28 = vunpack.c.l.bf16 %v192_v13  ;;  %v209_v29 = vunpack.c.l.bf16 %v193_v14 }
  0x33   :  { %v509_v30 = vadd.f32 %v508_v20, %v507_v10  ;;  %v516_v31 = vadd.f32 %v515_v21, %v514_v11  ;;  %v1051_v32 = vsel %vm979_vm4, %v495_v15, %v1050_v26  ;;  %v210_v33 = vunpack.c.l.bf16 %v194_v18  ;;  %v389_v18 = vld [vmem:[#allocation2 + $0x20] sm:$0x6] }
  0x34   :  { %v1052_v34 = vsel %vm981_vm5, %v502_v16, %v1051_v32  ;;  %v211_v35 = vunpack.c.l.bf16 %v195_v23  ;;  %v212_v36 = vunpack.c.l.bf16 %v196_v24  ;;  %v237_v37 = vrot.slane %v205_v19, 1  ;;  %v390_v23 = vld [vmem:[#allocation2 + $0x24] sm:$0x6] }
  0x35   :  { %v1053_v38 = vsel %vm983_vm6, %v509_v30, %v1052_v34  ;;  %v238_v39 = vrot.slane %v206_v25, 1  ;;  %v239_v40 = vrot.slane %v207_v27, 1  ;;  %v240_v41 = vrot.slane %v208_v28, 1  ;;  %v391_v28 = vld [vmem:[#allocation2 + $0x28] sm:$0x6] }
  0x36   :  { %v1054_v42 = vsel %vm985_vm7, %v516_v31, %v1053_v38  ;;  %v241_v43 = vrot.slane %v209_v29, 1  ;;  %v242_v44 = vrot.slane %v210_v33, 1  ;;  %v243_v45 = vrot.slane %v211_v35, 1  ;;  %v392_v29 = vld [vmem:[#allocation2 + $0x2c] sm:$0x6] }
  0x37   :  { %1062 = vrot.lane.b32.xlu1 %v1054_v42, %s1418_s0  ;;  %v244_v46 = vrot.slane %v212_v36, 1  ;;  %v269_v47 = vsel %vm76_vm0, %v237_v37, 0.0  ;;  %v276_v48 = vsel %vm76_vm0, %v238_v39, 0.0  ;;  %v283_v49 = vsel %vm76_vm0, %v239_v40, 0.0  ;;  %v393_v30 = vld [vmem:[#allocation2 + $0x30] sm:$0x6] }
  0x38   :  { %v270_v50 = vrot.slane %v269_v47, 4  ;;  %v277_v51 = vrot.slane %v276_v48, 4  ;;  %v284_v52 = vrot.slane %v283_v49, 4  ;;  %v290_v53 = vsel %vm76_vm0, %v240_v41, 0.0  ;;  %v394_v35 = vld [vmem:[#allocation2 + $0x34] sm:$0x6] }
  0x39   :  { %v291_v54 = vrot.slane %v290_v53, 4  ;;  %v297_v55 = vsel %vm76_vm0, %v241_v43, 0.0  ;;  %v304_v56 = vsel %vm76_vm0, %v242_v44, 0.0  ;;  %v311_v57 = vsel %vm76_vm0, %v243_v45, 0.0  ;;  %v395_v36 = vld [vmem:[#allocation2 + $0x38] sm:$0x6] }
  0x3a   :  { %v271_v58 = vadd.f32 %v270_v50, %v269_v47  ;;  %v278_v59 = vadd.f32 %v277_v51, %v276_v48  ;;  %v285_v60 = vadd.f32 %v284_v52, %v283_v49  ;;  %v298_v61 = vrot.slane %v297_v55, 4  ;;  %v396_v41 = vld [vmem:[#allocation2 + $0x3c] sm:$0x6] }
  0x3b   :  { %v292_v62 = vadd.f32 %v291_v54, %v290_v53  ;;  %v305_v63 = vrot.slane %v304_v56, 4  ;;  %v312_v0 = vrot.slane %v311_v57, 4  ;;  %v318_v1 = vsel %vm76_vm0, %v244_v46, 0.0 }
  0x3c   :  { %v272_v2 = vrot.slane %v271_v58, 2  ;;  %v279_v3 = vrot.slane %v278_v59, 2  ;;  %v286_v4 = vrot.slane %v285_v60, 2  ;;  %v299_v5 = vadd.f32 %v298_v61, %v297_v55 }
  0x3d   :  { %v293_v6 = vrot.slane %v292_v62, 2  ;;  %v306_v7 = vadd.f32 %v305_v63, %v304_v56  ;;  %v313_v8 = vadd.f32 %v312_v0, %v311_v57  ;;  %v319_v9 = vrot.slane %v318_v1, 4 }
  0x3e   :  { %v273_v10 = vadd.f32 %v272_v2, %v271_v58  ;;  %v280_v11 = vadd.f32 %v279_v3, %v278_v59  ;;  %v287_v12 = vadd.f32 %v286_v4, %v285_v60  ;;  %v300_v13 = vrot.slane %v299_v5, 2 }
  0x3f   :  { %v294_v14 = vadd.f32 %v293_v6, %v292_v62  ;;  %v307_v15 = vrot.slane %v306_v7, 2  ;;  %v314_v16 = vrot.slane %v313_v8, 2  ;;  %v320_v17 = vadd.f32 %v319_v9, %v318_v1 }
  0x40   :  { %v274_v19 = vrot.slane %v273_v10, 1  ;;  %v281_v20 = vrot.slane %v280_v11, 1  ;;  %v288_v21 = vrot.slane %v287_v12, 1  ;;  %v301_v22 = vadd.f32 %v300_v13, %v299_v5 }
  0x41   :  { %v295_v24 = vrot.slane %v294_v14, 1  ;;  %v308_v25 = vadd.f32 %v307_v15, %v306_v7  ;;  %v315_v26 = vadd.f32 %v314_v16, %v313_v8  ;;  %v321_v27 = vrot.slane %v320_v17, 2 }
  0x42   :  { %v275_v31 = vadd.f32 %v274_v19, %v273_v10  ;;  %v282_v32 = vadd.f32 %v281_v20, %v280_v11  ;;  %v289_v33 = vadd.f32 %v288_v21, %v287_v12  ;;  %v302_v34 = vrot.slane %v301_v22, 1 }
  0x43   :  { %v296_v37 = vadd.f32 %v295_v24, %v294_v14  ;;  %v309_v38 = vrot.slane %v308_v25, 1  ;;  %v316_v39 = vrot.slane %v315_v26, 1  ;;  %v322_v40 = vadd.f32 %v321_v27, %v320_v17 }
  0x44   :  { %v303_v42 = vadd.f32 %v302_v34, %v301_v22  ;;  %v1012_v43 = vsel %vm973_vm1, %v282_v32, %v275_v31  ;;  %v405_v44 = vunpack.c.l.bf16 %v389_v18  ;;  %v406_v45 = vunpack.c.l.bf16 %v390_v23 }
  0x45   :  { %v310_v46 = vadd.f32 %v309_v38, %v308_v25  ;;  %v317_v47 = vadd.f32 %v316_v39, %v315_v26  ;;  %v323_v48 = vrot.slane %v322_v40, 1  ;;  %v1013_v49 = vsel %vm975_vm2, %v289_v33, %v1012_v43 }
  0x46   :  { %v1014_v50 = vsel %vm977_vm3, %v296_v37, %v1013_v49  ;;  %v407_v51 = vunpack.c.l.bf16 %v391_v28  ;;  %v408_v52 = vunpack.c.l.bf16 %v392_v29  ;;  %v409_v53 = vunpack.c.l.bf16 %v393_v30 }
  0x47   :  { %v324_v54 = vadd.f32 %v323_v48, %v322_v40  ;;  %v1015_v55 = vsel %vm979_vm4, %v303_v42, %v1014_v50  ;;  %v410_v56 = vunpack.c.l.bf16 %v394_v35  ;;  %v411_v57 = vunpack.c.l.bf16 %v395_v36  ;;  %v197_v50 = vld [vmem:[#allocation2 + $0x20] sm:$0x7] }
  0x48   :  { %v1016_v58 = vsel %vm981_vm5, %v310_v46, %v1015_v55  ;;  %v412_v59 = vunpack.c.l.bf16 %v396_v41  ;;  %v437_v60 = vrot.slane %v405_v44, 2  ;;  %v438_v61 = vrot.slane %v406_v45, 2 }
  0x49   :  { %v1017_v62 = vsel %vm983_vm6, %v317_v47, %v1016_v58  ;;  %v439_v63 = vrot.slane %v407_v51, 2  ;;  %v440_v0 = vrot.slane %v408_v52, 2  ;;  %v441_v1 = vrot.slane %v409_v53, 2  ;;  %v198_v51 = vld [vmem:[#allocation2 + $0x24] sm:$0x7] }
  0x4a   :  { %v1018_v2 = vsel %vm985_vm7, %v324_v54, %v1017_v62  ;;  %v442_v3 = vrot.slane %v410_v56, 2  ;;  %v443_v4 = vrot.slane %v411_v57, 2  ;;  %v444_v5 = vrot.slane %v412_v59, 2  ;;  %v199_v52 = vld [vmem:[#allocation2 + $0x28] sm:$0x7] }
  0x4b   :  { %1026 = vrot.lane.b32.xlu0 %v1018_v2, %s1419_s1  ;;  %v517_v6 = vsel %vm76_vm0, %v437_v60, 0.0  ;;  %v524_v7 = vsel %vm76_vm0, %v438_v61, 0.0  ;;  %v531_v8 = vsel %vm76_vm0, %v439_v63, 0.0  ;;  %v538_v9 = vsel %vm76_vm0, %v440_v0, 0.0  ;;  %v200_v57 = vld [vmem:[#allocation2 + $0x2c] sm:$0x7] }
  0x4c   :  { %v518_v10 = vrot.slane %v517_v6, 4  ;;  %v525_v11 = vrot.slane %v524_v7, 4  ;;  %v532_v12 = vrot.slane %v531_v8, 4  ;;  %v539_v13 = vrot.slane %v538_v9, 4  ;;  %v201_v58 = vld [vmem:[#allocation2 + $0x30] sm:$0x7] }
  0x4d   :  { %v545_v14 = vsel %vm76_vm0, %v441_v1, 0.0  ;;  %v552_v15 = vsel %vm76_vm0, %v442_v3, 0.0  ;;  %v559_v16 = vsel %vm76_vm0, %v443_v4, 0.0  ;;  %v566_v17 = vsel %vm76_vm0, %v444_v5, 0.0  ;;  %v202_v63 = vld [vmem:[#allocation2 + $0x34] sm:$0x7] }
  0x4e   :  { %v519_v18 = vadd.f32 %v518_v10, %v517_v6  ;;  %v526_v19 = vadd.f32 %v525_v11, %v524_v7  ;;  %v533_v20 = vadd.f32 %v532_v12, %v531_v8  ;;  %v540_v21 = vadd.f32 %v539_v13, %v538_v9  ;;  %v203_v1 = vld [vmem:[#allocation2 + $0x38] sm:$0x7]  ;;  %v204_v2 = vld [vmem:[#allocation2 + $0x3c] sm:$0x7] }
  0x4f   :  { %v546_v22 = vrot.slane %v545_v14, 4  ;;  %v553_v23 = vrot.slane %v552_v15, 4  ;;  %v560_v24 = vrot.slane %v559_v16, 4  ;;  %v567_v25 = vrot.slane %v566_v17, 4 }
  0x50   :  { %v520_v26 = vrot.slane %v519_v18, 2  ;;  %v527_v27 = vrot.slane %v526_v19, 2  ;;  %v534_v28 = vrot.slane %v533_v20, 2  ;;  %v541_v29 = vrot.slane %v540_v21, 2 }
  0x51   :  { %v547_v30 = vadd.f32 %v546_v22, %v545_v14  ;;  %v554_v31 = vadd.f32 %v553_v23, %v552_v15  ;;  %v561_v32 = vadd.f32 %v560_v24, %v559_v16  ;;  %v568_v33 = vadd.f32 %v567_v25, %v566_v17 }
  0x52   :  { %v521_v34 = vadd.f32 %v520_v26, %v519_v18  ;;  %v528_v35 = vadd.f32 %v527_v27, %v526_v19  ;;  %v535_v36 = vadd.f32 %v534_v28, %v533_v20  ;;  %v542_v37 = vadd.f32 %v541_v29, %v540_v21 }
  0x53   :  { %v548_v38 = vrot.slane %v547_v30, 2  ;;  %v555_v39 = vrot.slane %v554_v31, 2  ;;  %v562_v40 = vrot.slane %v561_v32, 2  ;;  %v569_v41 = vrot.slane %v568_v33, 2 }
  0x54   :  { %v522_v42 = vrot.slane %v521_v34, 1  ;;  %v529_v43 = vrot.slane %v528_v35, 1  ;;  %v536_v44 = vrot.slane %v535_v36, 1  ;;  %v543_v45 = vrot.slane %v542_v37, 1 }
  0x55   :  { %v549_v46 = vadd.f32 %v548_v38, %v547_v30  ;;  %v556_v47 = vadd.f32 %v555_v39, %v554_v31  ;;  %v563_v48 = vadd.f32 %v562_v40, %v561_v32  ;;  %v570_v49 = vadd.f32 %v569_v41, %v568_v33 }
  0x56   :  { %v523_v53 = vadd.f32 %v522_v42, %v521_v34  ;;  %v530_v54 = vadd.f32 %v529_v43, %v528_v35  ;;  %v537_v55 = vadd.f32 %v536_v44, %v535_v36  ;;  %v544_v56 = vadd.f32 %v543_v45, %v542_v37 }
  0x57   :  { %v550_v59 = vrot.slane %v549_v46, 1  ;;  %v557_v60 = vrot.slane %v556_v47, 1  ;;  %v564_v61 = vrot.slane %v563_v48, 1  ;;  %v571_v62 = vrot.slane %v570_v49, 1 }
  0x58   :  { %v1055_v0 = vsel %vm973_vm1, %v530_v54, %v523_v53  ;;  %v213_v3 = vunpack.c.l.bf16 %v197_v50  ;;  %v214_v4 = vunpack.c.l.bf16 %v198_v51  ;;  %v215_v5 = vunpack.c.l.bf16 %v199_v52 }
  0x59   :  { %v551_v6 = vadd.f32 %v550_v59, %v549_v46  ;;  %v558_v7 = vadd.f32 %v557_v60, %v556_v47  ;;  %v565_v8 = vadd.f32 %v564_v61, %v563_v48  ;;  %v572_v9 = vadd.f32 %v571_v62, %v570_v49 }
  0x5a   :  { %v1056_v10 = vsel %vm975_vm2, %v537_v55, %v1055_v0  ;;  %v216_v11 = vunpack.c.l.bf16 %v200_v57  ;;  %v217_v12 = vunpack.c.l.bf16 %v201_v58  ;;  %v218_v13 = vunpack.c.l.bf16 %v202_v63 }
  0x5b   :  { %v1057_v14 = vsel %vm977_vm3, %v544_v56, %v1056_v10  ;;  %v219_v15 = vunpack.c.l.bf16 %v203_v1  ;;  %v220_v16 = vunpack.c.l.bf16 %v204_v2  ;;  %v245_v17 = vrot.slane %v213_v3, 1 }
  0x5c   :  { %v1058_v18 = vsel %vm979_vm4, %v551_v6, %v1057_v14  ;;  %v246_v19 = vrot.slane %v214_v4, 1  ;;  %v247_v20 = vrot.slane %v215_v5, 1  ;;  %v248_v21 = vrot.slane %v216_v11, 1  ;;  %v581_v6 = vld [vmem:[#allocation2 + $0x20] sm:$0xe] }
  0x5d   :  { %v1059_v22 = vsel %vm981_vm5, %v558_v7, %v1058_v18  ;;  %v249_v23 = vrot.slane %v217_v12, 1  ;;  %v250_v24 = vrot.slane %v218_v13, 1  ;;  %v251_v25 = vrot.slane %v219_v15, 1  ;;  %v582_v11 = vld [vmem:[#allocation2 + $0x24] sm:$0xe] }
  0x5e   :  { %v1060_v26 = vsel %vm983_vm6, %v565_v8, %v1059_v22  ;;  %v252_v27 = vrot.slane %v220_v16, 1  ;;  %v325_v28 = vsel %vm76_vm0, %v245_v17, 0.0  ;;  %v332_v29 = vsel %vm76_vm0, %v246_v19, 0.0  ;;  %v583_v16 = vld [vmem:[#allocation2 + $0x28] sm:$0xe] }
  0x5f   :  { %v1061_v30 = vsel %vm985_vm7, %v572_v9, %v1060_v26  ;;  %v326_v31 = vrot.slane %v325_v28, 4  ;;  %v333_v32 = vrot.slane %v332_v29, 4  ;;  %v339_v33 = vsel %vm76_vm0, %v247_v20, 0.0  ;;  %v584_v17 = vld [vmem:[#allocation2 + $0x2c] sm:$0xe] }
  0x60   :  { %1064 = vrot.lane.b32.xlu1 %v1061_v30, %s1418_s0  ;;  %v340_v34 = vrot.slane %v339_v33, 4  ;;  %v346_v35 = vsel %vm76_vm0, %v248_v21, 0.0  ;;  %v353_v36 = vsel %vm76_vm0, %v249_v23, 0.0  ;;  %v360_v37 = vsel %vm76_vm0, %v250_v24, 0.0  ;;  %v585_v21 = vld [vmem:[#allocation2 + $0x30] sm:$0xe] }
  0x61   :  { %v327_v38 = vadd.f32 %v326_v31, %v325_v28  ;;  %v334_v39 = vadd.f32 %v333_v32, %v332_v29  ;;  %v347_v40 = vrot.slane %v346_v35, 4  ;;  %v354_v41 = vrot.slane %v353_v36, 4  ;;  %v586_v22 = vld [vmem:[#allocation2 + $0x34] sm:$0xe]  ;;  %v587_v28 = vld [vmem:[#allocation2 + $0x38] sm:$0xe] }
  0x62   :  { %v341_v42 = vadd.f32 %v340_v34, %v339_v33  ;;  %v361_v43 = vrot.slane %v360_v37, 4  ;;  %v367_v44 = vsel %vm76_vm0, %v251_v25, 0.0  ;;  %v374_v45 = vsel %vm76_vm0, %v252_v27, 0.0  ;;  %v588_v29 = vld [vmem:[#allocation2 + $0x3c] sm:$0xe] }
  0x63   :  { %v328_v46 = vrot.slane %v327_v38, 2  ;;  %v335_v47 = vrot.slane %v334_v39, 2  ;;  %v348_v48 = vadd.f32 %v347_v40, %v346_v35  ;;  %v355_v49 = vadd.f32 %v354_v41, %v353_v36 }
  0x64   :  { %v342_v50 = vrot.slane %v341_v42, 2  ;;  %v362_v51 = vadd.f32 %v361_v43, %v360_v37  ;;  %v368_v52 = vrot.slane %v367_v44, 4  ;;  %v375_v53 = vrot.slane %v374_v45, 4 }
  0x65   :  { %v329_v54 = vadd.f32 %v328_v46, %v327_v38  ;;  %v336_v55 = vadd.f32 %v335_v47, %v334_v39  ;;  %v349_v56 = vrot.slane %v348_v48, 2  ;;  %v356_v57 = vrot.slane %v355_v49, 2 }
  0x66   :  { %v343_v58 = vadd.f32 %v342_v50, %v341_v42  ;;  %v363_v59 = vrot.slane %v362_v51, 2  ;;  %v369_v60 = vadd.f32 %v368_v52, %v367_v44  ;;  %v376_v61 = vadd.f32 %v375_v53, %v374_v45 }
  0x67   :  { %v330_v62 = vrot.slane %v329_v54, 1  ;;  %v337_v63 = vrot.slane %v336_v55, 1  ;;  %v350_v0 = vadd.f32 %v349_v56, %v348_v48  ;;  %v357_v1 = vadd.f32 %v356_v57, %v355_v49 }
  0x68   :  { %v344_v2 = vrot.slane %v343_v58, 1  ;;  %v364_v3 = vadd.f32 %v363_v59, %v362_v51  ;;  %v370_v4 = vrot.slane %v369_v60, 2  ;;  %v377_v5 = vrot.slane %v376_v61, 2 }
  0x69   :  { %v331_v7 = vadd.f32 %v330_v62, %v329_v54  ;;  %v338_v8 = vadd.f32 %v337_v63, %v336_v55  ;;  %v351_v9 = vrot.slane %v350_v0, 1  ;;  %v358_v10 = vrot.slane %v357_v1, 1 }
  0x6a   :  { %v345_v12 = vadd.f32 %v344_v2, %v343_v58  ;;  %v365_v13 = vrot.slane %v364_v3, 1  ;;  %v371_v14 = vadd.f32 %v370_v4, %v369_v60  ;;  %v378_v15 = vadd.f32 %v377_v5, %v376_v61 }
  0x6b   :  { %v352_v18 = vadd.f32 %v351_v9, %v350_v0  ;;  %v359_v19 = vadd.f32 %v358_v10, %v357_v1  ;;  %v1019_v20 = vsel %vm973_vm1, %v338_v8, %v331_v7  ;;  %v597_v23 = vunpack.c.l.bf16 %v581_v6 }
  0x6c   :  { %v366_v24 = vadd.f32 %v365_v13, %v364_v3  ;;  %v372_v25 = vrot.slane %v371_v14, 1  ;;  %v379_v26 = vrot.slane %v378_v15, 1  ;;  %v1020_v27 = vsel %vm975_vm2, %v345_v12, %v1019_v20 }
  0x6d   :  { %v1021_v30 = vsel %vm977_vm3, %v352_v18, %v1020_v27  ;;  %v598_v31 = vunpack.c.l.bf16 %v582_v11  ;;  %v599_v32 = vunpack.c.l.bf16 %v583_v16  ;;  %v600_v33 = vunpack.c.l.bf16 %v584_v17 }
  0x6e   :  { %v373_v34 = vadd.f32 %v372_v25, %v371_v14  ;;  %v380_v35 = vadd.f32 %v379_v26, %v378_v15  ;;  %v1022_v36 = vsel %vm979_vm4, %v359_v19, %v1021_v30  ;;  %v601_v37 = vunpack.c.l.bf16 %v585_v21  ;;  %v573_v30 = vld [vmem:[#allocation2] sm:$0xe] }
  0x6f   :  { %v1023_v38 = vsel %vm981_vm5, %v366_v24, %v1022_v36  ;;  %v602_v39 = vunpack.c.l.bf16 %v586_v22  ;;  %v603_v40 = vunpack.c.l.bf16 %v587_v28  ;;  %v604_v41 = vunpack.c.l.bf16 %v588_v29 }
  0x70   :  { %v1024_v42 = vsel %vm983_vm6, %v373_v34, %v1023_v38  ;;  %v629_v43 = vrot.slane %v597_v23, 3  ;;  %v630_v44 = vrot.slane %v598_v31, 3  ;;  %v631_v45 = vrot.slane %v599_v32, 3 }
  0x71   :  { %v1025_v46 = vsel %vm985_vm7, %v380_v35, %v1024_v42  ;;  %v632_v47 = vrot.slane %v600_v33, 3  ;;  %v633_v48 = vrot.slane %v601_v37, 3  ;;  %v634_v49 = vrot.slane %v602_v39, 3  ;;  %v574_v35 = vld [vmem:[#allocation2 + $0x4] sm:$0xe] }
  0x72   :  { %1028 = vrot.lane.b32.xlu0 %v1025_v46, %s1419_s1  ;;  %v635_v50 = vrot.slane %v603_v40, 3  ;;  %v636_v51 = vrot.slane %v604_v41, 3  ;;  %v709_v52 = vsel %vm76_vm0, %v629_v43, 0.0  ;;  %v716_v53 = vsel %vm76_vm0, %v630_v44, 0.0  ;;  %v575_v40 = vld [vmem:[#allocation2 + $0x8] sm:$0xe] }
  0x73   :  { %v710_v54 = vrot.slane %v709_v52, 4  ;;  %v717_v55 = vrot.slane %v716_v53, 4  ;;  %v723_v56 = vsel %vm76_vm0, %v631_v45, 0.0  ;;  %v730_v57 = vsel %vm76_vm0, %v632_v47, 0.0  ;;  %v576_v41 = vld [vmem:[#allocation2 + $0xc] sm:$0xe] }
  0x74   :  { %v724_v58 = vrot.slane %v723_v56, 4  ;;  %v731_v59 = vrot.slane %v730_v57, 4  ;;  %v737_v60 = vsel %vm76_vm0, %v633_v48, 0.0  ;;  %v744_v61 = vsel %vm76_vm0, %v634_v49, 0.0  ;;  %v577_v42 = vld [vmem:[#allocation2 + $0x10] sm:$0xe] }
  0x75   :  { %v711_v62 = vadd.f32 %v710_v54, %v709_v52  ;;  %v718_v63 = vadd.f32 %v717_v55, %v716_v53  ;;  %v738_v0 = vrot.slane %v737_v60, 4  ;;  %v745_v1 = vrot.slane %v744_v61, 4  ;;  %v578_v46 = vld [vmem:[#allocation2 + $0x14] sm:$0xe]  ;;  %v580_v52 = vld [vmem:[#allocation2 + $0x1c] sm:$0xe] }
  0x76   :  { %v725_v2 = vadd.f32 %v724_v58, %v723_v56  ;;  %v732_v3 = vadd.f32 %v731_v59, %v730_v57  ;;  %v751_v4 = vsel %vm76_vm0, %v635_v50, 0.0  ;;  %v758_v5 = vsel %vm76_vm0, %v636_v51, 0.0  ;;  %v579_v51 = vld [vmem:[#allocation2 + $0x18] sm:$0xe] }
  0x77   :  { %v712_v6 = vrot.slane %v711_v62, 2  ;;  %v719_v7 = vrot.slane %v718_v63, 2  ;;  %v739_v8 = vadd.f32 %v738_v0, %v737_v60  ;;  %v746_v9 = vadd.f32 %v745_v1, %v744_v61 }
  0x78   :  { %v726_v10 = vrot.slane %v725_v2, 2  ;;  %v733_v11 = vrot.slane %v732_v3, 2  ;;  %v752_v12 = vrot.slane %v751_v4, 4  ;;  %v759_v13 = vrot.slane %v758_v5, 4 }
  0x79   :  { %v713_v14 = vadd.f32 %v712_v6, %v711_v62  ;;  %v720_v15 = vadd.f32 %v719_v7, %v718_v63  ;;  %v740_v16 = vrot.slane %v739_v8, 2  ;;  %v747_v17 = vrot.slane %v746_v9, 2 }
  0x7a   :  { %v727_v18 = vadd.f32 %v726_v10, %v725_v2  ;;  %v734_v19 = vadd.f32 %v733_v11, %v732_v3  ;;  %v753_v20 = vadd.f32 %v752_v12, %v751_v4  ;;  %v760_v21 = vadd.f32 %v759_v13, %v758_v5 }
  0x7b   :  { %v714_v22 = vrot.slane %v713_v14, 1  ;;  %v721_v23 = vrot.slane %v720_v15, 1  ;;  %v741_v24 = vadd.f32 %v740_v16, %v739_v8  ;;  %v748_v25 = vadd.f32 %v747_v17, %v746_v9 }
  0x7c   :  { %v728_v26 = vrot.slane %v727_v18, 1  ;;  %v735_v27 = vrot.slane %v734_v19, 1  ;;  %v754_v28 = vrot.slane %v753_v20, 2  ;;  %v761_v29 = vrot.slane %v760_v21, 2 }
  0x7d   :  { %v715_v31 = vadd.f32 %v714_v22, %v713_v14  ;;  %v722_v32 = vadd.f32 %v721_v23, %v720_v15  ;;  %v742_v33 = vrot.slane %v741_v24, 1  ;;  %v749_v34 = vrot.slane %v748_v25, 1 }
  0x7e   :  { %v729_v36 = vadd.f32 %v728_v26, %v727_v18  ;;  %v736_v37 = vadd.f32 %v735_v27, %v734_v19  ;;  %v755_v38 = vadd.f32 %v754_v28, %v753_v20  ;;  %v762_v39 = vadd.f32 %v761_v29, %v760_v21 }
  0x7f   :  { %v743_v43 = vadd.f32 %v742_v33, %v741_v24  ;;  %v750_v44 = vadd.f32 %v749_v34, %v748_v25  ;;  %v1091_v45 = vsel %vm973_vm1, %v722_v32, %v715_v31  ;;  %v589_v47 = vunpack.c.l.bf16 %v573_v30 }
  0x80   :  { %v756_v48 = vrot.slane %v755_v38, 1  ;;  %v763_v49 = vrot.slane %v762_v39, 1  ;;  %v1092_v50 = vsel %vm975_vm2, %v729_v36, %v1091_v45  ;;  %v590_v53 = vunpack.c.l.bf16 %v574_v35 }
  0x81   :  { %v1093_v54 = vsel %vm977_vm3, %v736_v37, %v1092_v50  ;;  %v591_v55 = vunpack.c.l.bf16 %v575_v40  ;;  %v592_v56 = vunpack.c.l.bf16 %v576_v41  ;;  %v593_v57 = vunpack.c.l.bf16 %v577_v42 }
  0x82   :  { %v757_v58 = vadd.f32 %v756_v48, %v755_v38  ;;  %v764_v59 = vadd.f32 %v763_v49, %v762_v39  ;;  %v1094_v60 = vsel %vm979_vm4, %v743_v43, %v1093_v54  ;;  %v594_v61 = vunpack.c.l.bf16 %v578_v46  ;;  %v773_v54 = vld [vmem:[#allocation2 + $0x20] sm:$0xc] }
  0x83   :  { %v1095_v62 = vsel %vm981_vm5, %v750_v44, %v1094_v60  ;;  %v595_v63 = vunpack.c.l.bf16 %v579_v51  ;;  %v596_v0 = vunpack.c.l.bf16 %v580_v52  ;;  %v621_v1 = vrot.slane %v589_v47, 3  ;;  %v775_v60 = vld [vmem:[#allocation2 + $0x28] sm:$0xc] }
  0x84   :  { %v1096_v2 = vsel %vm983_vm6, %v757_v58, %v1095_v62  ;;  %v622_v3 = vrot.slane %v590_v53, 3  ;;  %v623_v4 = vrot.slane %v591_v55, 3  ;;  %v624_v5 = vrot.slane %v592_v56, 3  ;;  %v774_v55 = vld [vmem:[#allocation2 + $0x24] sm:$0xc] }
  0x85   :  { %v1097_v6 = vsel %vm985_vm7, %v764_v59, %v1096_v2  ;;  %v625_v7 = vrot.slane %v593_v57, 3  ;;  %v626_v8 = vrot.slane %v594_v61, 3  ;;  %v627_v9 = vrot.slane %v595_v63, 3  ;;  %v777_v2 = vld [vmem:[#allocation2 + $0x30] sm:$0xc] }
  0x86   :  { %1100 = vrot.lane.b32.xlu1 %v1097_v6, %s1420_s24  ;;  %v628_v10 = vrot.slane %v596_v0, 3  ;;  %v653_v11 = vsel %vm76_vm0, %v621_v1, 0.0  ;;  %v660_v12 = vsel %vm76_vm0, %v622_v3, 0.0  ;;  %v667_v13 = vsel %vm76_vm0, %v623_v4, 0.0  ;;  %v776_v1 = vld [vmem:[#allocation2 + $0x2c] sm:$0xc] }
  0x87   :  { %v654_v14 = vrot.slane %v653_v11, 4  ;;  %v661_v15 = vrot.slane %v660_v12, 4  ;;  %v668_v16 = vrot.slane %v667_v13, 4  ;;  %v674_v17 = vsel %vm76_vm0, %v624_v5, 0.0  ;;  %v778_v5 = vld [vmem:[#allocation2 + $0x34] sm:$0xc] }
  0x88   :  { %v675_v18 = vrot.slane %v674_v17, 4  ;;  %v681_v19 = vsel %vm76_vm0, %v625_v7, 0.0  ;;  %v688_v20 = vsel %vm76_vm0, %v626_v8, 0.0  ;;  %v695_v21 = vsel %vm76_vm0, %v627_v9, 0.0  ;;  %v779_v6 = vld [vmem:[#allocation2 + $0x38] sm:$0xc] }
  0x89   :  { %v655_v22 = vadd.f32 %v654_v14, %v653_v11  ;;  %v662_v23 = vadd.f32 %v661_v15, %v660_v12  ;;  %v669_v24 = vadd.f32 %v668_v16, %v667_v13  ;;  %v682_v25 = vrot.slane %v681_v19, 4  ;;  %v780_v13 = vld [vmem:[#allocation2 + $0x3c] sm:$0xc] }
  0x8a   :  { %v676_v26 = vadd.f32 %v675_v18, %v674_v17  ;;  %v689_v27 = vrot.slane %v688_v20, 4  ;;  %v696_v28 = vrot.slane %v695_v21, 4  ;;  %v702_v29 = vsel %vm76_vm0, %v628_v10, 0.0 }
  0x8b   :  { %v656_v30 = vrot.slane %v655_v22, 2  ;;  %v663_v31 = vrot.slane %v662_v23, 2  ;;  %v670_v32 = vrot.slane %v669_v24, 2  ;;  %v683_v33 = vadd.f32 %v682_v25, %v681_v19 }
  0x8c   :  { %v677_v34 = vrot.slane %v676_v26, 2  ;;  %v690_v35 = vadd.f32 %v689_v27, %v688_v20  ;;  %v697_v36 = vadd.f32 %v696_v28, %v695_v21  ;;  %v703_v37 = vrot.slane %v702_v29, 4 }
  0x8d   :  { %v657_v38 = vadd.f32 %v656_v30, %v655_v22  ;;  %v664_v39 = vadd.f32 %v663_v31, %v662_v23  ;;  %v671_v40 = vadd.f32 %v670_v32, %v669_v24  ;;  %v684_v41 = vrot.slane %v683_v33, 2 }
  0x8e   :  { %v678_v42 = vadd.f32 %v677_v34, %v676_v26  ;;  %v691_v43 = vrot.slane %v690_v35, 2  ;;  %v698_v44 = vrot.slane %v697_v36, 2  ;;  %v704_v45 = vadd.f32 %v703_v37, %v702_v29 }
  0x8f   :  { %v658_v46 = vrot.slane %v657_v38, 1  ;;  %v665_v47 = vrot.slane %v664_v39, 1  ;;  %v672_v48 = vrot.slane %v671_v40, 1  ;;  %v685_v49 = vadd.f32 %v684_v41, %v683_v33 }
  0x90   :  { %v679_v50 = vrot.slane %v678_v42, 1  ;;  %v692_v51 = vadd.f32 %v691_v43, %v690_v35  ;;  %v699_v52 = vadd.f32 %v698_v44, %v697_v36  ;;  %v705_v53 = vrot.slane %v704_v45, 2 }
  0x91   :  { %v659_v56 = vadd.f32 %v658_v46, %v657_v38  ;;  %v666_v57 = vadd.f32 %v665_v47, %v664_v39  ;;  %v673_v58 = vadd.f32 %v672_v48, %v671_v40  ;;  %v686_v59 = vrot.slane %v685_v49, 1 }
  0x92   :  { %v680_v61 = vadd.f32 %v679_v50, %v678_v42  ;;  %v693_v62 = vrot.slane %v692_v51, 1  ;;  %v700_v63 = vrot.slane %v699_v52, 1  ;;  %v706_v0 = vadd.f32 %v705_v53, %v704_v45 }
  0x93   :  { %v687_v3 = vadd.f32 %v686_v59, %v685_v49  ;;  %v1084_v4 = vsel %vm973_vm1, %v666_v57, %v659_v56  ;;  %v789_v7 = vunpack.c.l.bf16 %v773_v54  ;;  %v790_v8 = vunpack.c.l.bf16 %v774_v55 }
  0x94   :  { %v694_v9 = vadd.f32 %v693_v62, %v692_v51  ;;  %v701_v10 = vadd.f32 %v700_v63, %v699_v52  ;;  %v707_v11 = vrot.slane %v706_v0, 1  ;;  %v1085_v12 = vsel %vm975_vm2, %v673_v58, %v1084_v4 }
  0x95   :  { %v1086_v14 = vsel %vm977_vm3, %v680_v61, %v1085_v12  ;;  %v791_v15 = vunpack.c.l.bf16 %v775_v60  ;;  %v792_v16 = vunpack.c.l.bf16 %v776_v1  ;;  %v793_v17 = vunpack.c.l.bf16 %v777_v2 }
  0x96   :  { %v708_v18 = vadd.f32 %v707_v11, %v706_v0  ;;  %v1087_v19 = vsel %vm979_vm4, %v687_v3, %v1086_v14  ;;  %v794_v20 = vunpack.c.l.bf16 %v778_v5  ;;  %v795_v21 = vunpack.c.l.bf16 %v779_v6  ;;  %v765_v14 = vld [vmem:[#allocation2] sm:$0xc] }
  0x97   :  { %v1088_v22 = vsel %vm981_vm5, %v694_v9, %v1087_v19  ;;  %v796_v23 = vunpack.c.l.bf16 %v780_v13  ;;  %v821_v24 = vrot.slane %v789_v7, 4  ;;  %v822_v25 = vrot.slane %v790_v8, 4 }
  0x98   :  { %v1089_v26 = vsel %vm983_vm6, %v701_v10, %v1088_v22  ;;  %v823_v27 = vrot.slane %v791_v15, 4  ;;  %v824_v28 = vrot.slane %v792_v16, 4  ;;  %v825_v29 = vrot.slane %v793_v17, 4  ;;  %v766_v15 = vld [vmem:[#allocation2 + $0x4] sm:$0xc] }
  0x99   :  { %v1090_v30 = vsel %vm985_vm7, %v708_v18, %v1089_v26  ;;  %v826_v31 = vrot.slane %v794_v20, 4  ;;  %v827_v32 = vrot.slane %v795_v21, 4  ;;  %v828_v33 = vrot.slane %v796_v23, 4  ;;  %v767_v16 = vld [vmem:[#allocation2 + $0x8] sm:$0xc] }
  0x9a   :  { %1098 = vrot.lane.b32.xlu0 %v1090_v30, %s1420_s24  ;;  %v901_v34 = vsel %vm76_vm0, %v821_v24, 0.0  ;;  %v908_v35 = vsel %vm76_vm0, %v822_v25, 0.0  ;;  %v915_v36 = vsel %vm76_vm0, %v823_v27, 0.0  ;;  %v922_v37 = vsel %vm76_vm0, %v824_v28, 0.0  ;;  %v768_v21 = vld [vmem:[#allocation2 + $0xc] sm:$0xc] }
  0x9b   :  { %v902_v38 = vrot.slane %v901_v34, 4  ;;  %v909_v39 = vrot.slane %v908_v35, 4  ;;  %v916_v40 = vrot.slane %v915_v36, 4  ;;  %v923_v41 = vrot.slane %v922_v37, 4  ;;  %v769_v22 = vld [vmem:[#allocation2 + $0x10] sm:$0xc] }
  0x9c   :  { %v929_v42 = vsel %vm76_vm0, %v825_v29, 0.0  ;;  %v936_v43 = vsel %vm76_vm0, %v826_v31, 0.0  ;;  %v943_v44 = vsel %vm76_vm0, %v827_v32, 0.0  ;;  %v950_v45 = vsel %vm76_vm0, %v828_v33, 0.0  ;;  %v770_v27 = vld [vmem:[#allocation2 + $0x14] sm:$0xc] }
  0x9d   :  { %v903_v46 = vadd.f32 %v902_v38, %v901_v34  ;;  %v910_v47 = vadd.f32 %v909_v39, %v908_v35  ;;  %v917_v48 = vadd.f32 %v916_v40, %v915_v36  ;;  %v924_v49 = vadd.f32 %v923_v41, %v922_v37  ;;  %v771_v29 = vld [vmem:[#allocation2 + $0x18] sm:$0xc]  ;;  %v772_v30 = vld [vmem:[#allocation2 + $0x1c] sm:$0xc] }
  0x9e   :  { %v930_v50 = vrot.slane %v929_v42, 4  ;;  %v937_v51 = vrot.slane %v936_v43, 4  ;;  %v944_v52 = vrot.slane %v943_v44, 4  ;;  %v951_v53 = vrot.slane %v950_v45, 4 }
  0x9f   :  { %v904_v54 = vrot.slane %v903_v46, 2  ;;  %v911_v55 = vrot.slane %v910_v47, 2  ;;  %v918_v56 = vrot.slane %v917_v48, 2  ;;  %v925_v57 = vrot.slane %v924_v49, 2 }
  0xa0   :  { %v931_v58 = vadd.f32 %v930_v50, %v929_v42  ;;  %v938_v59 = vadd.f32 %v937_v51, %v936_v43  ;;  %v945_v60 = vadd.f32 %v944_v52, %v943_v44  ;;  %v952_v61 = vadd.f32 %v951_v53, %v950_v45 }
  0xa1   :  { %v905_v62 = vadd.f32 %v904_v54, %v903_v46  ;;  %v912_v63 = vadd.f32 %v911_v55, %v910_v47  ;;  %v919_v0 = vadd.f32 %v918_v56, %v917_v48  ;;  %v926_v1 = vadd.f32 %v925_v57, %v924_v49 }
  0xa2   :  { %v932_v2 = vrot.slane %v931_v58, 2  ;;  %v939_v3 = vrot.slane %v938_v59, 2  ;;  %v946_v4 = vrot.slane %v945_v60, 2  ;;  %v953_v5 = vrot.slane %v952_v61, 2 }
  0xa3   :  { %v906_v6 = vrot.slane %v905_v62, 1  ;;  %v913_v7 = vrot.slane %v912_v63, 1  ;;  %v920_v8 = vrot.slane %v919_v0, 1  ;;  %v927_v9 = vrot.slane %v926_v1, 1 }
  0xa4   :  { %v933_v10 = vadd.f32 %v932_v2, %v931_v58  ;;  %v940_v11 = vadd.f32 %v939_v3, %v938_v59  ;;  %v947_v12 = vadd.f32 %v946_v4, %v945_v60  ;;  %v954_v13 = vadd.f32 %v953_v5, %v952_v61 }
  0xa5   :  { %v907_v17 = vadd.f32 %v906_v6, %v905_v62  ;;  %v914_v18 = vadd.f32 %v913_v7, %v912_v63  ;;  %v921_v19 = vadd.f32 %v920_v8, %v919_v0  ;;  %v928_v20 = vadd.f32 %v927_v9, %v926_v1 }
  0xa6   :  { %v934_v23 = vrot.slane %v933_v10, 1  ;;  %v941_v24 = vrot.slane %v940_v11, 1  ;;  %v948_v25 = vrot.slane %v947_v12, 1  ;;  %v955_v26 = vrot.slane %v954_v13, 1 }
  0xa7   :  { %v1127_v28 = vsel %vm973_vm1, %v914_v18, %v907_v17  ;;  %v781_v31 = vunpack.c.l.bf16 %v765_v14  ;;  %v782_v32 = vunpack.c.l.bf16 %v766_v15  ;;  %v783_v33 = vunpack.c.l.bf16 %v767_v16 }
  0xa8   :  { %v935_v34 = vadd.f32 %v934_v23, %v933_v10  ;;  %v942_v35 = vadd.f32 %v941_v24, %v940_v11  ;;  %v949_v36 = vadd.f32 %v948_v25, %v947_v12  ;;  %v956_v37 = vadd.f32 %v955_v26, %v954_v13 }
  0xa9   :  { %v1128_v38 = vsel %vm975_vm2, %v921_v19, %v1127_v28  ;;  %v784_v39 = vunpack.c.l.bf16 %v768_v21  ;;  %v785_v40 = vunpack.c.l.bf16 %v769_v22  ;;  %v786_v41 = vunpack.c.l.bf16 %v770_v27 }
  0xaa   :  { %v1129_v42 = vsel %vm977_vm3, %v928_v20, %v1128_v38  ;;  %v787_v43 = vunpack.c.l.bf16 %v771_v29  ;;  %v788_v44 = vunpack.c.l.bf16 %v772_v30  ;;  %v813_v45 = vrot.slane %v781_v31, 4  ;;  %v1340_v38 = vld [vmem:[#allocation5 + $0x38] sm:$0xff]  }
  0xab   :  { %v1130_v46 = vsel %vm979_vm4, %v935_v34, %v1129_v42  ;;  %v814_v47 = vrot.slane %v782_v32, 4  ;;  %v815_v48 = vrot.slane %v783_v33, 4  ;;  %v816_v49 = vrot.slane %v784_v39, 4 }
  0xac   :  { %v1131_v50 = vsel %vm981_vm5, %v942_v35, %v1130_v46  ;;  %v817_v51 = vrot.slane %v785_v40, 4  ;;  %v818_v52 = vrot.slane %v786_v41, 4  ;;  %v819_v53 = vrot.slane %v787_v43, 4 }
  0xad   :  { %v1132_v54 = vsel %vm983_vm6, %v949_v36, %v1131_v50  ;;  %v820_v55 = vrot.slane %v788_v44, 4  ;;  %v845_v56 = vsel %vm76_vm0, %v813_v45, 0.0  ;;  %v852_v57 = vsel %vm76_vm0, %v814_v47, 0.0 }
  0xae   :  { %v1133_v58 = vsel %vm985_vm7, %v956_v37, %v1132_v54  ;;  %v846_v59 = vrot.slane %v845_v56, 4  ;;  %v853_v60 = vrot.slane %v852_v57, 4  ;;  %v859_v61 = vsel %vm76_vm0, %v815_v48, 0.0 }
  0xaf   :  { %1136 = vrot.lane.b32.xlu1 %v1133_v58, %s1415_s15  ;;  %v860_v62 = vrot.slane %v859_v61, 4  ;;  %v866_v63 = vsel %vm76_vm0, %v816_v49, 0.0  ;;  %v873_v0 = vsel %vm76_vm0, %v817_v51, 0.0  ;;  %v880_v1 = vsel %vm76_vm0, %v818_v52, 0.0  ;;  %v1341_v52 = vld [vmem:[#allocation5 + $0x30] sm:$0xff]  }
  0xb0   :  { %v847_v2 = vadd.f32 %v846_v59, %v845_v56  ;;  %v854_v3 = vadd.f32 %v853_v60, %v852_v57  ;;  %v867_v4 = vrot.slane %v866_v63, 4  ;;  %v874_v5 = vrot.slane %v873_v0, 4  ;;  %v1342_v59 = vld [vmem:[#allocation5 + $0x28] sm:$0xff]   ;;  %v1343_v60 = vld [vmem:[#allocation5 + $0x20] sm:$0xff]  }
  0xb1   :  { %v861_v6 = vadd.f32 %v860_v62, %v859_v61  ;;  %v881_v7 = vrot.slane %v880_v1, 4  ;;  %v887_v8 = vsel %vm76_vm0, %v819_v53, 0.0  ;;  %v894_v9 = vsel %vm76_vm0, %v820_v55, 0.0  ;;  %v1344_v61 = vld [vmem:[#allocation5 + $0x18] sm:$0xff]   ;;  %v1345_v62 = vld [vmem:[#allocation5 + $0x10] sm:$0xff]  }
  0xb2   :  { %v848_v10 = vrot.slane %v847_v2, 2  ;;  %v855_v11 = vrot.slane %v854_v3, 2  ;;  %v868_v12 = vadd.f32 %v867_v4, %v866_v63  ;;  %v875_v13 = vadd.f32 %v874_v5, %v873_v0  ;;  %v1346_v63 = vld [vmem:[#allocation5 + $0x8] sm:$0xff]   ;;  %v1347_v0 = vld [vmem:[#allocation5] sm:$0xff]  }
  0xb3   :  { %v862_v14 = vrot.slane %v861_v6, 2  ;;  %v882_v15 = vadd.f32 %v881_v7, %v880_v1  ;;  %v888_v16 = vrot.slane %v887_v8, 4  ;;  %v895_v17 = vrot.slane %v894_v9, 4  ;;  %v52_v1 = vld [vmem:[#allocation2 + $0x20] sm:$0x3] }
  0xb4   :  { %v849_v18 = vadd.f32 %v848_v10, %v847_v2  ;;  %v856_v19 = vadd.f32 %v855_v11, %v854_v3  ;;  %v869_v20 = vrot.slane %v868_v12, 2  ;;  %v876_v21 = vrot.slane %v875_v13, 2  ;;  %v53_v2 = vld [vmem:[#allocation2 + $0x24] sm:$0x3]  ;;  %v54_v3 = vld [vmem:[#allocation2 + $0x28] sm:$0x3] }
  0xb5   :  { %v863_v22 = vadd.f32 %v862_v14, %v861_v6  ;;  %v883_v23 = vrot.slane %v882_v15, 2  ;;  %v889_v24 = vadd.f32 %v888_v16, %v887_v8  ;;  %v896_v25 = vadd.f32 %v895_v17, %v894_v9  ;;  %v44_v6 = vld [vmem:[#allocation2] sm:$0x3]  ;;  %v45_v7 = vld [vmem:[#allocation2 + $0x4] sm:$0x3] }
  0xb6   :  { %v850_v26 = vrot.slane %v849_v18, 1  ;;  %v857_v27 = vrot.slane %v856_v19, 1  ;;  %v870_v28 = vadd.f32 %v869_v20, %v868_v12  ;;  %v877_v29 = vadd.f32 %v876_v21, %v875_v13  ;;  %v55_v8 = vld [vmem:[#allocation2 + $0x2c] sm:$0x3]  ;;  %v46_v13 = vld [vmem:[#allocation2 + $0x8] sm:$0x3] }
  0xb7   :  { %v864_v30 = vrot.slane %v863_v22, 1  ;;  %v884_v31 = vadd.f32 %v883_v23, %v882_v15  ;;  %v890_v32 = vrot.slane %v889_v24, 2  ;;  %v897_v33 = vrot.slane %v896_v25, 2  ;;  %v56_v15 = vld [vmem:[#allocation2 + $0x30] sm:$0x3] }
  0xb8   :  { %v851_v34 = vadd.f32 %v850_v26, %v849_v18  ;;  %v858_v35 = vadd.f32 %v857_v27, %v856_v19  ;;  %v871_v36 = vrot.slane %v870_v28, 1  ;;  %v878_v37 = vrot.slane %v877_v29, 1  ;;  %v47_v20 = vld [vmem:[#allocation2 + $0xc] sm:$0x3]  ;;  %v48_v21 = vld [vmem:[#allocation2 + $0x10] sm:$0x3] }
  0xb9   :  { %v865_v39 = vadd.f32 %v864_v30, %v863_v22  ;;  %v885_v40 = vrot.slane %v884_v31, 1  ;;  %v891_v41 = vadd.f32 %v890_v32, %v889_v24  ;;  %v898_v42 = vadd.f32 %v897_v33, %v896_v25  ;;  %v57_v24 = vld [vmem:[#allocation2 + $0x34] sm:$0x3] }
  0xba   :  { %v872_v43 = vadd.f32 %v871_v36, %v870_v28  ;;  %v879_v44 = vadd.f32 %v878_v37, %v877_v29  ;;  %v1120_v45 = vsel %vm973_vm1, %v858_v35, %v851_v34  ;;  %v1421_v50 = vmov 0.0   ;;  %v58_v34 = vld [vmem:[#allocation2 + $0x38] sm:$0x3]  ;;  %v49_v36 = vld [vmem:[#allocation2 + $0x14] sm:$0x3] }
  0xbb   :  { %v886_v46 = vadd.f32 %v885_v40, %v884_v31  ;;  %v892_v47 = vrot.slane %v891_v41, 1  ;;  %v899_v48 = vrot.slane %v898_v42, 1  ;;  %v1121_v49 = vsel %vm975_vm2, %v865_v39, %v1120_v45  ;;  %1308 = vmatprep.subr.bf16.mxu0 %v1421_v50 }
  0xbc   :  { %v1122_v51 = vsel %vm977_vm3, %v872_v43, %v1121_v49  ;;  %1309 = vmatpush3.bf16.msra.mxu0 %v1340_v38  ;;  %vm1422_vm8 = vmmov 0   ;;  %v68_v4 = vunpack.c.l.bf16 %v52_v1  ;;  %v69_v5 = vunpack.c.l.bf16 %v53_v2 }
  0xbd   :  { %v893_v53 = vadd.f32 %v892_v47, %v891_v41  ;;  %v900_v54 = vadd.f32 %v899_v48, %v898_v42  ;;  %v1123_v55 = vsel %vm979_vm4, %v879_v44, %v1122_v51  ;;  %1310 = vmatprep.subr.bf16.mxu0 %v1421_v50  ;;  %1324 = vmatprep.mubr.msk.bf16.mxu0 %vm1422_vm8, %v1421_v50  ;;  %v70_v9 = vunpack.c.l.bf16 %v54_v3  ;;  %v50_v41 = vld [vmem:[#allocation2 + $0x18] sm:$0x3]  ;;  %v59_v44 = vld [vmem:[#allocation2 + $0x3c] sm:$0x3] }
  0xbe   :  { %v1124_v56 = vsel %vm981_vm5, %v886_v46, %v1123_v55  ;;  %v133_v10 = vsel %vm76_vm0, %v68_v4, 0.0  ;;  %v140_v11 = vsel %vm76_vm0, %v69_v5, 0.0  ;;  %v60_v12 = vunpack.c.l.bf16 %v44_v6  ;;  %v51_v3 = vld [vmem:[#allocation2 + $0x1c] sm:$0x3] }
  0xbf   :  { %v1125_v57 = vsel %vm983_vm6, %v893_v53, %v1124_v56  ;;  %v61_v14 = vunpack.c.l.bf16 %v45_v7  ;;  %v71_v16 = vunpack.c.l.bf16 %v55_v8  ;;  %v134_v17 = vrot.slane %v133_v10, 4 }
  0xc0   :  { %v1126_v58 = vsel %vm985_vm7, %v900_v54, %v1125_v57  ;;  %1311 = vmatpush3.bf16.msra.mxu0 %v1341_v52  ;;  %v141_v18 = vrot.slane %v140_v11, 4  ;;  %v147_v19 = vsel %vm76_vm0, %v70_v9, 0.0  ;;  %v62_v22 = vunpack.c.l.bf16 %v46_v13 }
  0xc1   :  { %1134 = vrot.lane.b32.xlu0 %v1126_v58, %s1415_s15  ;;  %1312 = vmatprep.subr.bf16.mxu0 %v1421_v50  ;;  %v77_v23 = vsel %vm76_vm0, %v60_v12, 0.0  ;;  %v72_v25 = vunpack.c.l.bf16 %v56_v15  ;;  %v84_v26 = vsel %vm76_vm0, %v61_v14, 0.0  ;;  %v148_v27 = vrot.slane %v147_v19, 4 }
  0xc2   :  { %v154_v28 = vsel %vm76_vm0, %v71_v16, 0.0  ;;  %v63_v29 = vunpack.c.l.bf16 %v47_v20  ;;  %v135_v30 = vadd.f32 %v134_v17, %v133_v10  ;;  %v142_v31 = vadd.f32 %v141_v18, %v140_v11 }
  0xc3   :  { %v64_v32 = vunpack.c.l.bf16 %v48_v21  ;;  %v78_v33 = vrot.slane %v77_v23, 4  ;;  %v73_v35 = vunpack.c.l.bf16 %v57_v24  ;;  %v85_v37 = vrot.slane %v84_v26, 4 }
  0xc4   :  { %1313 = vmatpush3.bf16.msra.mxu0 %v1342_v59  ;;  %v91_v38 = vsel %vm76_vm0, %v62_v22, 0.0  ;;  %v155_v39 = vrot.slane %v154_v28, 4  ;;  %v161_v40 = vsel %vm76_vm0, %v72_v25, 0.0  ;;  %v149_v42 = vadd.f32 %v148_v27, %v147_v19 }
  0xc5   :  { %1314 = vmatprep.subr.bf16.mxu0 %v1421_v50  ;;  %v98_v43 = vsel %vm76_vm0, %v63_v29, 0.0  ;;  %v74_v45 = vunpack.c.l.bf16 %v58_v34  ;;  %v136_v46 = vrot.slane %v135_v30, 2  ;;  %v143_v47 = vrot.slane %v142_v31, 2 }
  0xc6   :  { %v65_v48 = vunpack.c.l.bf16 %v49_v36  ;;  %v92_v49 = vrot.slane %v91_v38, 4  ;;  %v168_v51 = vsel %vm76_vm0, %v73_v35, 0.0  ;;  %v79_v52 = vadd.f32 %v78_v33, %v77_v23 }
  0xc7   :  { %v86_v53 = vadd.f32 %v85_v37, %v84_v26  ;;  %v105_v54 = vsel %vm76_vm0, %v64_v32, 0.0  ;;  %v156_v55 = vadd.f32 %v155_v39, %v154_v28  ;;  %v66_v56 = vunpack.c.l.bf16 %v50_v41 }
  0xc8   :  { %1315 = vmatpush3.bf16.msra.mxu0 %v1343_v60  ;;  %v99_v57 = vrot.slane %v98_v43, 4  ;;  %v75_v58 = vunpack.c.l.bf16 %v59_v44  ;;  %v150_v59 = vrot.slane %v149_v42, 2  ;;  %v137_v60 = vadd.f32 %v136_v46, %v135_v30 }
  0xc9   :  { %1316 = vmatprep.subr.bf16.mxu0 %v1421_v50  ;;  %v106_v1 = vrot.slane %v105_v54, 4  ;;  %v80_v4 = vrot.slane %v79_v52, 2  ;;  %v87_v5 = vrot.slane %v86_v53, 2  ;;  %v112_v6 = vsel %vm76_vm0, %v65_v48, 0.0 }
  0xca   :  { %v157_v7 = vrot.slane %v156_v55, 2  ;;  %v119_v8 = vsel %vm76_vm0, %v66_v56, 0.0  ;;  %v151_v9 = vadd.f32 %v150_v59, %v149_v42  ;;  %v182_v11 = vsel %vm76_vm0, %v75_v58, 0.0 }
  0xcb   :  { %v100_v12 = vadd.f32 %v99_v57, %v98_v43  ;;  %v138_v13 = vrot.slane %v137_v60, 1  ;;  %v67_v16 = vunpack.c.l.bf16 %v51_v3  ;;  %v113_v18 = vrot.slane %v112_v6, 4 }
  0xcc   :  { %1317 = vmatpush3.bf16.msra.mxu0 %v1344_v61  ;;  %v144_v61 = vadd.f32 %v143_v47, %v142_v31  ;;  %v81_v20 = vadd.f32 %v80_v4, %v79_v52  ;;  %v88_v21 = vadd.f32 %v87_v5, %v86_v53  ;;  %v158_v22 = vadd.f32 %v157_v7, %v156_v55 }
  0xcd   :  { %1318 = vmatprep.subr.bf16.mxu0 %v1421_v50  ;;  %v183_v23 = vrot.slane %v182_v11, 4  ;;  %v107_v24 = vadd.f32 %v106_v1, %v105_v54  ;;  %v120_v25 = vrot.slane %v119_v8, 4  ;;  %v152_v26 = vrot.slane %v151_v9, 1 }
  0xce   :  { %v145_v14 = vrot.slane %v144_v61, 1  ;;  %v101_v28 = vrot.slane %v100_v12, 2  ;;  %v139_v29 = vadd.f32 %v138_v13, %v137_v60  ;;  %v114_v33 = vadd.f32 %v113_v18, %v112_v6  ;;  %v1027_v18 = vpop.permute.xlu0 %1026 }
  0xcf   :  { %v126_v34 = vsel %vm76_vm0, %v67_v16, 0.0  ;;  %v82_v36 = vrot.slane %v81_v20, 1  ;;  %v89_v37 = vrot.slane %v88_v21, 1  ;;  %v184_v39 = vadd.f32 %v183_v23, %v182_v11 }
  0xd0   :  { %1319 = vmatpush3.bf16.msra.mxu0 %v1345_v62  ;;  %v169_v62 = vrot.slane %v168_v51, 4  ;;  %v146_v30 = vadd.f32 %v145_v14, %v144_v61  ;;  %v153_v41 = vadd.f32 %v152_v26, %v151_v9  ;;  %v102_v43 = vadd.f32 %v101_v28, %v100_v12  ;;  %v1063_v61 = vpop.permute.xlu1 %1062 }
  0xd1   :  { %1320 = vmatprep.subr.bf16.mxu0 %v1421_v50  ;;  %v127_v44 = vrot.slane %v126_v34, 4  ;;  %v115_v48 = vrot.slane %v114_v33, 2  ;;  %v90_v52 = vadd.f32 %v89_v37, %v88_v21  ;;  %v185_v54 = vrot.slane %v184_v39, 2 }
  0xd2   :  { %v170_v15 = vadd.f32 %v169_v62, %v168_v51  ;;  %v987_v46 = vsel %vm973_vm1, %v146_v30, %v139_v29  ;;  %v83_v51 = vadd.f32 %v82_v36, %v81_v20  ;;  %v103_v58 = vrot.slane %v102_v43, 1 }
  0xd3   :  { %v988_v57 = vsel %vm975_vm2, %v153_v41, %v987_v46  ;;  %v128_v59 = vadd.f32 %v127_v44, %v126_v34  ;;  %v116_v1 = vadd.f32 %v115_v48, %v114_v33  ;;  %v186_v3 = vadd.f32 %v185_v54, %v184_v39 }
  0xd4   :  { %1321 = vmatpush3.bf16.msra.mxu0 %v1346_v63  ;;  %v175_v63 = vsel %vm76_vm0, %v74_v45, 0.0  ;;  %v171_v31 = vrot.slane %v170_v15, 2  ;;  %v104_v7 = vadd.f32 %v103_v58, %v102_v43  ;;  %v1065_v16 = vpop.permute.xlu1 %1064  ;;  %vm1140_vm9 = vcmask 130048  }
  0xd5   :  { %1322 = vmatprep.subr.bf16.mxu0 %v1421_v50  ;;  %v162_v50 = vrot.slane %v161_v40, 4  ;;  %v176_v10 = vrot.slane %v175_v63, 4  ;;  %v117_v13 = vrot.slane %v116_v1, 1  ;;  %v187_v14 = vrot.slane %v186_v3, 1 }
  0xd6   :  { %v172_v45 = vadd.f32 %v171_v31, %v170_v15  ;;  %vm1146_vm10 = vcmask 392192   ;;  %vm1143_vm11 = vcmask 261120   ;;  %vm1149_vm12 = vcmask 523264  }
  0xd7   :  { %v163_v2 = vadd.f32 %v162_v50, %v161_v40  ;;  %v177_v27 = vadd.f32 %v176_v10, %v175_v63  ;;  %v108_v40 = vrot.slane %v107_v24, 2  ;;  %v118_v23 = vadd.f32 %v117_v13, %v116_v1 }
  0xd8   :  { %1323 = vmatpush3.bf16.msra.mxu0 %v1347_v0  ;;  %v93_v0 = vadd.f32 %v92_v49, %v91_v38  ;;  %v159_v38 = vrot.slane %v158_v22, 1  ;;  %v121_v49 = vadd.f32 %v120_v25, %v119_v8  ;;  %v173_v60 = vrot.slane %v172_v45, 1 }
  0xd9   :  { %v164_v19 = vrot.slane %v163_v2, 2  ;;  %v178_v42 = vrot.slane %v177_v27, 2  ;;  %v109_v55 = vadd.f32 %v108_v40, %v107_v24  ;;  %v129_v8 = vrot.slane %v128_v59, 2 }
  0xda   :  { %v94_v17 = vrot.slane %v93_v0, 2  ;;  %v160_v53 = vadd.f32 %v159_v38, %v158_v22  ;;  %v122_v63 = vrot.slane %v121_v49, 2  ;;  %v174_v9 = vadd.f32 %v173_v60, %v172_v45 }
  0xdb   :  { %v165_v35 = vadd.f32 %v164_v19, %v163_v2  ;;  %v179_v56 = vadd.f32 %v178_v42, %v177_v27  ;;  %v974_v2 = vsel %vm973_vm1, %v90_v52, %v83_v51  ;;  %v110_v5 = vrot.slane %v109_v55, 1  ;;  %v1290_v52 = vld [vmem:[%s1622_s2] ss:$0 sm:$0xff] }
  0xdc   :  { %v95_v32 = vadd.f32 %v94_v17, %v93_v0  ;;  %v989_v4 = vsel %vm977_vm3, %v160_v53, %v988_v57  ;;  %v123_v10 = vadd.f32 %v122_v63, %v121_v49  ;;  %v130_v19 = vadd.f32 %v129_v8, %v128_v59 }
  0xdd   :  { %v166_v50 = vrot.slane %v165_v35, 1  ;;  %v180_v6 = vrot.slane %v179_v56, 1  ;;  %v111_v15 = vadd.f32 %v110_v5, %v109_v55  ;;  %v188_v24 = vadd.f32 %v187_v14, %v186_v3 }
  0xde   :  { %v96_v47 = vrot.slane %v95_v32, 1  ;;  %v124_v22 = vrot.slane %v123_v10, 1  ;;  %v131_v27 = vrot.slane %v130_v19, 1  ;;  %vm1152_vm13 = vcmask 654336  }
  0xdf   :  { %v167_v0 = vadd.f32 %v166_v50, %v165_v35  ;;  %v181_v17 = vadd.f32 %v180_v6, %v179_v56 }
  0xe0   :  { %v97_v62 = vadd.f32 %v96_v47, %v95_v32  ;;  %v125_v28 = vadd.f32 %v124_v22, %v123_v10  ;;  %v132_v33 = vadd.f32 %v131_v27, %v130_v19 }
  0xe1   :  { %v990_v12 = vsel %vm979_vm4, %v167_v0, %v989_v4 }
  0xe2   :  { %v976_v11 = vsel %vm975_vm2, %v97_v62, %v974_v2  ;;  %v991_v21 = vsel %vm981_vm5, %v174_v9, %v990_v12 }
  0xe3   :  { %v978_v20 = vsel %vm977_vm3, %v104_v7, %v976_v11  ;;  %v992_v26 = vsel %vm983_vm6, %v181_v17, %v991_v21 }
  0xe4   :  { %v980_v25 = vsel %vm979_vm4, %v111_v15, %v978_v20  ;;  %v1029_v31 = vpop.permute.xlu0 %1028  ;;  %v993_v32 = vsel %vm985_vm7, %v188_v24, %v992_v26 }
  0xe5   :  { %v982_v30 = vsel %vm981_vm5, %v118_v23, %v980_v25  ;;  %v1142_v35 = vsel %vm1140_vm9, %v993_v32, %v1029_v31 }
  0xe6   :  { %v984_v34 = vsel %vm983_vm6, %v125_v28, %v982_v30  ;;  %v1145_v38 = vsel %vm1143_vm11, %v1142_v35, %v1065_v16 }
  0xe7   :  { %v986_v37 = vsel %vm985_vm7, %v132_v33, %v984_v34 }
  0xe8   :  { %v1141_v42 = vsel %vm1140_vm9, %v986_v37, %v1027_v18 }
  0xe9   :  { %v1144_v44 = vsel %vm1143_vm11, %v1141_v42, %v1063_v61 }
  0xf8   :  { %v1101_v29 = vpop.permute.xlu1 %1100 }
  0xf9   :  { %v1148_v39 = vsel %vm1146_vm10, %v1145_v38, %v1101_v29 }
 0x10c   :  { %v1099_v40 = vpop.permute.xlu0 %1098 }
 0x10d   :  { %v1147_v45 = vsel %vm1146_vm10, %v1144_v44, %v1099_v40 }
 0x121   :  { %v1137_v36 = vpop.permute.xlu1 %1136 }
 0x122   :  { %v1151_v41 = vsel %vm1149_vm12, %v1148_v39, %v1137_v36 }
 0x123   :  { %v1154_v43 = vsel %vm1152_vm13, %v1151_v41, 0.0 }
 0x124   :  { %v1156_v47 = vmul.f32 0.25, %v1154_v43 }
 0x133   :  { %v1135_v46 = vpop.permute.xlu0 %1134 }
 0x134   :  { %v1150_v48 = vsel %vm1149_vm12, %v1147_v45, %v1135_v46 }
 0x135   :  { %v1153_v49 = vsel %vm1152_vm13, %v1150_v48, 0.0 }
 0x136   :  { %v1155_v50 = vmul.f32 0.25, %v1153_v49 }
 0x138   :  { %v1157_v51 = vpack.c.bf16 %v1156_v47, %v1155_v50 }
 0x13a   :  { %1325 = vmatmul.mubr.bf16.vlgmr.msra.gmra.mxu0 %v1157_v51 }
 0x1fa   :  { %v1263_v53 = vpop.f32.mrf.mxu0 }
 0x1fb   :  { %v1264_v54 = vadd.f32 %v1290_v52, %v1263_v53 }
 0x1fc   :  { %v1326_v55 = vpop.f32.mrf.mxu0 }
 0x1fd   :  { %1270 = vst [vmem:[#allocation7] sm:$0xff] %v1264_v54 }
 0x1fe   :  { %v1266_v56 = vpop.f32.mrf.mxu0 }
 0x1ff   :  { %v1267_v57 = vadd.f32 %v1290_v52, %v1266_v56 }
 0x200   :  { %v1327_v58 = vpop.f32.mrf.mxu0 }
 0x201   :  { %1271 = vst [vmem:[#allocation7 + $0x8] sm:$0xff] %v1267_v57 }
 0x202   :  { %1399 = shalt.err (!%p1396_p0)
}
 0x203   :  { %s1424_s30 = smov 128   ;;  %s1425_s2 = smov 8  }
 0x204   :  { %1283 = dma.vmem_to_hbm [thread:$0]  %s1278_s28, 256, %s1623_s3, [#allocation4], %s1424_s30, %s1424_s30, %s1425_s2  }
 0x205   :  { %1412 = dma.done.wait [#allocation4], 256  }
 0x206   :  { %1413 = vsyncadd [#allocation4], 4294967040 }
 0x207   :  { %1287 = vsyncpa [#allocation3], 1 }
 0x208   :  { %1288 = vsyncpa [#allocation6], 1 }
 0x209   :  { %1289 = vsyncpa [#allocation4], 1 }

</bundles_post_ra>
